<compile_context>
chip_gen: v7x
topology: tpu7x:2x2x1
jax: 0.10.0
libtpu: 0.0.40
codegen_flags: <defaults>
</compile_context>

<pallas_src>
import math
import jax
import jax.numpy as jnp
from jax.experimental import pallas as pl
from jax.experimental.pallas import tpu as pltpu


# ---------------------------------------------------------------------------
# Kernel A: per-batch GCN + Linear(H, 128) + tanh  (runs once per batch row)
#   h[b] = tanh( (adj[b] @ (x[b] @ Wg)) @ W1 + b1 )
# ---------------------------------------------------------------------------
def _gcn_frontend_kernel(x_ref, adj_ref, gw_ref, w1_ref, b1_ref, h_ref):
    # x_ref: (P, H), adj_ref: (P, P), gw_ref: (H, H), w1_ref: (H, D1),
    # b1_ref: (1, D1), h_ref: (P, D1).   All f32 (tiny, runs once -> exact).
    support = jnp.dot(x_ref[...], gw_ref[...],
                      preferred_element_type=jnp.float32)            # (P, H)
    g = jnp.dot(adj_ref[...], support,
                preferred_element_type=jnp.float32)                  # (P, H)
    h = jnp.dot(g, w1_ref[...],
                preferred_element_type=jnp.float32) + b1_ref[...]    # (P, D1)
    h_ref[...] = jnp.tanh(h)


def gcn_frontend(x, adj, gcn_w, w1, b1):
    """x: (B, P, H) f32, adj: (B, P, P) f32  ->  h: (B, P, D1) f32."""
    B, P, H = x.shape
    D1 = w1.shape[1]
    return pl.pallas_call(
        _gcn_frontend_kernel,
        out_shape=jax.ShapeDtypeStruct((B, P, D1), jnp.float32),
        grid=(B,),
        in_specs=[
            pl.BlockSpec((None, P, H), lambda b: (b, 0, 0)),
            pl.BlockSpec((None, P, P), lambda b: (b, 0, 0)),
            pl.BlockSpec((H, H), lambda b: (0, 0)),
            pl.BlockSpec((H, D1), lambda b: (0, 0)),
            pl.BlockSpec((1, D1), lambda b: (0, 0)),
        ],
        out_specs=pl.BlockSpec((None, P, D1), lambda b: (b, 0, 0)),
        compiler_params=pltpu.CompilerParams(
            dimension_semantics=("parallel",),
            vmem_limit_bytes=64 * 1024 * 1024),
    )(x, adj, gcn_w, w1, b1)


# ---------------------------------------------------------------------------
# Kernel B: out[i-tile, j-tile] = h[i-tile] @ W2[:, j-tile] + b2[j-tile]
# ---------------------------------------------------------------------------
def _trans_out_kernel(h_ref, w2_ref, b2_ref, out_ref):
    # h_ref: (tm, D1) f32, w2_ref: (D1, td) f32|bf16, b2_ref: (1, td) f32,
    # out_ref: (tm, td) f32|bf16.
    # Note: if M % tm != 0, the padded rows of the last h tile produce garbage
    # output rows which Pallas discards on writeback (no cross-row mixing here).
    acc = jnp.dot(h_ref[...].astype(w2_ref.dtype), w2_ref[...],
                  preferred_element_type=jnp.float32)                # f32 acc
    out_ref[...] = (acc + b2_ref[...]).astype(out_ref.dtype)


def trans_out_matmul(h2, w2, b2, *, out_dtype=jnp.float32,
                     tile_m=512, tile_d2=2048):
    """h2: (M, D1), w2: (D1, D2), b2: (1, D2)  ->  (M, D2) in out_dtype.

    Grid order is (D2-tiles, M-tiles): the w2/b2 block index is constant across
    the inner M axis, so each w2 tile is DMA'd from HBM exactly once.
    """
    M, D1 = h2.shape
    D2 = w2.shape[1]
    tm = M if M <= tile_m else tile_m
    td = D2 if D2 <= tile_d2 else tile_d2
    grid = (pl.cdiv(D2, td), pl.cdiv(M, tm))
    return pl.pallas_call(
        _trans_out_kernel,
        out_shape=jax.ShapeDtypeStruct((M, D2), out_dtype),
        grid=grid,
        in_specs=[
            pl.BlockSpec((tm, D1), lambda j, i: (i, 0)),   # re-streamed (tiny)
            pl.BlockSpec((D1, td), lambda j, i: (0, j)),   # held across inner i
            pl.BlockSpec((1, td), lambda j, i: (0, j)),
        ],
        out_specs=pl.BlockSpec((tm, td), lambda j, i: (i, j)),
        compiler_params=pltpu.CompilerParams(
            dimension_semantics=("parallel", "parallel"),   # v7x 2-TC sharding
            vmem_limit_bytes=64 * 1024 * 1024),
    )(h2, w2, b2)


# ---------------------------------------------------------------------------
# Full module forward (prefix_tuning=True path)
# ---------------------------------------------------------------------------
def code_graph_prefix_forward(params, prefix, matrix, max_source_length, *,
                              use_bf16=True, tile_m=512, tile_d2=2048):
    """
    prefix: (B, P) int32 token ids
    matrix: (B, P, P) float adjacency
    returns past_key_values: (B, max_source_length, num_layers*2*hidden)
            dtype bf16 if use_bf16 else f32 (exact module semantics).
    """
    B, P = prefix.shape

    # Embedding gather (glue, plain JAX).
    x = jnp.take(params["emb"], prefix, axis=0).astype(jnp.float32)   # (B, P, H)
    adj = matrix.astype(jnp.float32)

    # Stage 1 (Pallas): GCN + Linear(H,128) + tanh on the UNIQUE prefix rows.
    h = gcn_frontend(x, adj, params["gcn_w"], params["w1"], params["b1"])

    # Stage 2 (Pallas): (B*P, 128) @ (128, D2) + b2, tiled on D2.
    if use_bf16:
        w2 = params["w2"].astype(jnp.bfloat16)      # dominant HBM operand
        out_dtype = jnp.bfloat16                    # output is HBM-write bound
    else:
        w2 = params["w2"]
        out_dtype = jnp.float32
    out = trans_out_matmul(h.reshape(B * P, -1), w2, params["b2"],
                           out_dtype=out_dtype, tile_m=tile_m, tile_d2=tile_d2)
    D2 = out.shape[-1]
    out = out.reshape(B, P, D2)

    # Replicate along the sequence AFTER the MLP (trans is row-wise, so it
    # commutes with repeat).  Single gather -> one write of the final tensor.
    # Same order as torch: [prefix[:rem], prefix repeated reps times].
    reps = max_source_length // P
    rem = max_source_length % P
    body = jnp.tile(jnp.arange(P, dtype=jnp.int32), reps)
    idx = jnp.concatenate([jnp.arange(rem, dtype=jnp.int32), body]) if rem else body
    return jnp.take(out, idx, axis=1)


def init_params(key, vocab_size, hidden_size, num_hidden_layers,
                prefix_hidden_size=128):
    k_emb, k_gcn, k_w1, k_b1, k_w2, k_b2 = jax.random.split(key, 6)
    out_dim = num_hidden_layers * 2 * hidden_size
    stdv = 1.0 / math.sqrt(hidden_size)  # GCNLayer.reset_parameters
    return {
        "emb": jax.random.normal(k_emb, (vocab_size, hidden_size),
                                 jnp.float32) * 0.02,
        "gcn_w": jax.random.uniform(k_gcn, (hidden_size, hidden_size),
                                    jnp.float32, minval=-stdv, maxval=stdv),
        "w1": jax.random.normal(k_w1, (hidden_size, prefix_hidden_size),
                                jnp.float32) * (1.0 / math.sqrt(hidden_size)),
        "b1": jax.random.normal(k_b1, (1, prefix_hidden_size),
                                jnp.float32) * 0.01,
        "w2": jax.random.normal(k_w2, (prefix_hidden_size, out_dim),
                                jnp.float32) * (1.0 / math.sqrt(prefix_hidden_size)),
        "b2": jax.random.normal(k_b2, (1, out_dim), jnp.float32) * 0.01,
    }


def _reference_forward(params, prefix, matrix, max_source_length):
    """Pure-JAX f32 reference, same op order as the torch module."""
    x = jnp.take(params["emb"], prefix, axis=0).astype(jnp.float32)
    support = jnp.einsum("bph,hk->bpk", x, params["gcn_w"])
    g = jnp.einsum("bpq,bqh->bph", matrix.astype(jnp.float32), support)
    B, P, H = g.shape
    rep = jnp.tile(g, (1, max_source_length // P, 1))
    rem = max_source_length % P
    if rem:
        rep = jnp.concatenate([g[:, :rem, :], rep], axis=1)
    hh = jnp.tanh(rep @ params["w1"] + params["b1"])
    return jnp.dot(hh, params["w2"],
                   preferred_element_type=jnp.float32) + params["b2"]


if __name__ == "__main__":
    # Small config consistent with the module.
    vocab_size = 50
    hidden_size = 32
    num_hidden_layers = 4            # D2 = 4*2*32 = 256
    prefix_len = 8
    max_source_length = 20           # exercises the "% != 0" concat branch
    batch = 2

    key = jax.random.PRNGKey(0)
    k_params, k_prefix, k_adj = jax.random.split(key, 3)

    params = init_params(k_params, vocab_size, hidden_size, num_hidden_layers)
    prefix = jax.random.randint(k_prefix, (batch, prefix_len), 0, vocab_size,
                                dtype=jnp.int32)
    matrix = jax.random.uniform(k_adj, (batch, prefix_len, prefix_len),
                                jnp.float32)
    matrix = matrix / jnp.sum(matrix, axis=-1, keepdims=True)

    expected_shape = (batch, max_source_length,
                      num_hidden_layers * 2 * hidden_size)
    ref = _reference_forward(params, prefix, matrix, max_source_length)

    # Exact (f32) path; tile_m=8 / tile_d2=128 exercise multi-tile M and D2 grids.
    out_f32 = code_graph_prefix_forward(params, prefix, matrix,
                                        max_source_length, use_bf16=False,
                                        tile_m=8, tile_d2=128)
    out_f32 = jax.block_until_ready(out_f32)
    assert out_f32.shape == expected_shape, (out_f32.shape, expected_shape)
    assert jnp.allclose(out_f32, ref, atol=1e-3, rtol=1e-3), \
        float(jnp.max(jnp.abs(out_f32 - ref)))

    # Default fast path: bf16 w2 + bf16 output (opt-in quantization, default on).
    out_bf16 = code_graph_prefix_forward(params, prefix, matrix,
                                         max_source_length)
    out_bf16 = jax.block_until_ready(out_bf16)
    assert out_bf16.shape == expected_shape, (out_bf16.shape, expected_shape)
    assert out_bf16.dtype == jnp.bfloat16
    assert jnp.allclose(out_bf16.astype(jnp.float32), ref,
                        atol=3e-2, rtol=3e-2), \
        float(jnp.max(jnp.abs(out_bf16.astype(jnp.float32) - ref)))

    print("KERNEL_OK")
</pallas_src>

<mosaic_0001>
module attributes {stable_mosaic.version = 11 : i64} {
  func.func @_gcn_frontend_kernel(%arg0: i32, %arg1: memref<1x8x32xf32, #tpu.memory_space<vmem>>, %arg2: memref<1x8x8xf32, #tpu.memory_space<vmem>>, %arg3: memref<32x32xf32, #tpu.memory_space<vmem>>, %arg4: memref<32x128xf32, #tpu.memory_space<vmem>>, %arg5: memref<1x128xf32, #tpu.memory_space<vmem>>, %arg6: memref<1x8x128xf32, #tpu.memory_space<vmem>>) attributes {dimension_semantics = [#tpu.dimension_semantics<parallel>], iteration_bounds = array<i64: 2>, scalar_prefetch = 0 : i64, scratch_operands = 0 : i64, tpu.core_type = #tpu.core_type<tc>, window_params = [{transform_indices = @transform_0, window_bounds = array<i64: 1, 8, 32>}, {transform_indices = @transform_1, window_bounds = array<i64: 1, 8, 8>}, {pipeline_mode = #tpu.pipeline_mode<synchronous>, transform_indices = @transform_2, window_bounds = array<i64: 32, 32>}, {pipeline_mode = #tpu.pipeline_mode<synchronous>, transform_indices = @transform_3, window_bounds = array<i64: 32, 128>}, {pipeline_mode = #tpu.pipeline_mode<synchronous>, transform_indices = @transform_4, window_bounds = array<i64: 1, 128>}, {transform_indices = @transform_5, window_bounds = array<i64: 1, 8, 128>}]} {
    %c0 = arith.constant 0 : index
    %c0_0 = arith.constant 0 : index
    %c0_1 = arith.constant 0 : index
    %0 = vector.load %arg1[%c0, %c0_0, %c0_1] : memref<1x8x32xf32, #tpu.memory_space<vmem>>, vector<1x8x32xf32>
    %1 = vector.shape_cast %0 : vector<1x8x32xf32> to vector<8x32xf32>
    %c0_2 = arith.constant 0 : index
    %c0_3 = arith.constant 0 : index
    %2 = vector.load %arg3[%c0_2, %c0_3] : memref<32x32xf32, #tpu.memory_space<vmem>>, vector<32x32xf32>
    %cst = arith.constant dense<0.000000e+00> : vector<8x32xf32>
    %3 = tpu.matmul %1, %2, %cst {dimension_numbers = #tpu.dot_dimension_numbers<[1], [0], [0], [1], [0, 0, 1, 1], [], []>} : vector<8x32xf32>, vector<32x32xf32>, vector<8x32xf32> -> vector<8x32xf32>
    %c0_4 = arith.constant 0 : index
    %c0_5 = arith.constant 0 : index
    %c0_6 = arith.constant 0 : index
    %4 = vector.load %arg2[%c0_4, %c0_5, %c0_6] : memref<1x8x8xf32, #tpu.memory_space<vmem>>, vector<1x8x8xf32>
    %5 = vector.shape_cast %4 : vector<1x8x8xf32> to vector<8x8xf32>
    %cst_7 = arith.constant dense<0.000000e+00> : vector<8x32xf32>
    %6 = tpu.matmul %5, %3, %cst_7 {dimension_numbers = #tpu.dot_dimension_numbers<[1], [0], [0], [1], [0, 0, 1, 1], [], []>} : vector<8x8xf32>, vector<8x32xf32>, vector<8x32xf32> -> vector<8x32xf32>
    %c0_8 = arith.constant 0 : index
    %c0_9 = arith.constant 0 : index
    %7 = vector.load %arg4[%c0_8, %c0_9] : memref<32x128xf32, #tpu.memory_space<vmem>>, vector<32x128xf32>
    %cst_10 = arith.constant dense<0.000000e+00> : vector<8x128xf32>
    %8 = tpu.matmul %6, %7, %cst_10 {dimension_numbers = #tpu.dot_dimension_numbers<[1], [0], [0], [1], [0, 0, 1, 1], [], []>} : vector<8x32xf32>, vector<32x128xf32>, vector<8x128xf32> -> vector<8x128xf32>
    %c0_11 = arith.constant 0 : index
    %c0_12 = arith.constant 0 : index
    %9 = vector.load %arg5[%c0_11, %c0_12] : memref<1x128xf32, #tpu.memory_space<vmem>>, vector<1x128xf32>
    %10 = vector.broadcast %9 : vector<1x128xf32> to vector<8x128xf32>
    %11 = arith.addf %8, %10 : vector<8x128xf32>
    %12 = math.tanh %11 : vector<8x128xf32>
    %c0_13 = arith.constant 0 : index
    %c0_14 = arith.constant 0 : index
    %c0_15 = arith.constant 0 : index
    %13 = vector.load %arg6[%c0_13, %c0_14, %c0_15] : memref<1x8x128xf32, #tpu.memory_space<vmem>>, vector<1x8x128xf32>
    %14 = vector.shape_cast %13 : vector<1x8x128xf32> to vector<8x128xf32>
    %15 = vector.shape_cast %12 : vector<8x128xf32> to vector<1x8x128xf32>
    tpu.vector_store %arg6[%c0_13, %c0_14, %c0_15], %15 {strides = array<i32>} : memref<1x8x128xf32, #tpu.memory_space<vmem>>, vector<1x8x128xf32>,
    return
  }
  func.func @transform_0(%arg0: i32) -> (i32, i32, i32) {
    %c0_i32 = arith.constant 0 : i32
    %c0_i32_0 = arith.constant 0 : i32
    %c0_i32_1 = arith.constant 0 : i32
    return %arg0, %c0_i32, %c0_i32_0 : i32, i32, i32
  }
  func.func @transform_1(%arg0: i32) -> (i32, i32, i32) {
    %c0_i32 = arith.constant 0 : i32
    %c0_i32_0 = arith.constant 0 : i32
    %c0_i32_1 = arith.constant 0 : i32
    return %arg0, %c0_i32, %c0_i32_0 : i32, i32, i32
  }
  func.func @transform_2(%arg0: i32) -> (i32, i32) {
    %c0_i32 = arith.constant 0 : i32
    %c0_i32_0 = arith.constant 0 : i32
    %c0_i32_1 = arith.constant 0 : i32
    return %c0_i32, %c0_i32_0 : i32, i32
  }
  func.func @transform_3(%arg0: i32) -> (i32, i32) {
    %c0_i32 = arith.constant 0 : i32
    %c0_i32_0 = arith.constant 0 : i32
    %c0_i32_1 = arith.constant 0 : i32
    return %c0_i32, %c0_i32_0 : i32, i32
  }
  func.func @transform_4(%arg0: i32) -> (i32, i32) {
    %c0_i32 = arith.constant 0 : i32
    %c0_i32_0 = arith.constant 0 : i32
    %c0_i32_1 = arith.constant 0 : i32
    return %c0_i32, %c0_i32_0 : i32, i32
  }
  func.func @transform_5(%arg0: i32) -> (i32, i32, i32) {
    %c0_i32 = arith.constant 0 : i32
    %c0_i32_0 = arith.constant 0 : i32
    %c0_i32_1 = arith.constant 0 : i32
    return %arg0, %c0_i32, %c0_i32_0 : i32, i32, i32
  }
}

</mosaic_0001>

<bundles_post_ra>
// kernel: tpu_custom_call.1
= control target key start
LH: loop header
LB: loop body
LE: loop exit
PB: predicated region body
PF: predicated region fallthrough
CT: control target
= control target key end

     0   :  { %s1421_s0 = inlined_call_operand.hbm [shape: f32[2,8,32], index: 0, kind: input, shape index: {}]   ;;  %s1422_s1 = inlined_call_operand.hbm [shape: f32[2,8,8], index: 1, kind: input, shape index: {}]   ;;  %s1423_s2 = inlined_call_operand.hbm [shape: f32[32,32], index: 2, kind: input, shape index: {}]   ;;  %s1424_s3 = inlined_call_operand.hbm [shape: f32[32,128], index: 3, kind: input, shape index: {}]   ;;  %s1425_s4 = inlined_call_operand.hbm [shape: f32[1,128], index: 4, kind: input, shape index: {}]   ;;  %s1426_s5 = inlined_call_operand.hbm [shape: f32[2,8,128], index: 5, kind: output, shape index: {}]  }
   0x1   :  { %1431 = sst [smem:[#allocation17_spill]] %s1423_s2 }
   0x2   :  { %1432 = sst [smem:[#allocation18_spill]] %s1424_s3 }
   0x3   :  { %10 = vsyncpa [#allocation3], 0 }
   0x4   :  { %12 = vsyncpa [#allocation3 + $0x1], 0 }
   0x5   :  { %13 = vsyncpa [#allocation6], 0 }
   0x6   :  { %15 = vsyncpa [#allocation6 + $0x1], 0 }
   0x7   :  { %16 = vsyncpa [#allocation9], 0 }
   0x8   :  { %17 = vsyncpa [#allocation4], 0 }
   0x9   :  { %19 = vsyncpa [#allocation4 + $0x1], 0  ;;  %s1123_s18 = smov 0   ;;  %s1125_s19 = smov 0  }
   0xa   :  { %s1127_s20 = smov 0   ;;  %s1129_s21 = smov 0  }
   0xb LB: > { %s1144_s22 = sadd.s32 4294967295, %s1080_s21   ;;  %s693_s23 = sadd.s32 4294967294, %s1080_s21   ;;  %s1080_s21 = sphi %s1129_s21, %s1455_s21   ;;  %s1076_s20 = sphi %s1127_s20, %s1454_s20   ;;  %s1072_s19 = sphi %s1125_s19, %s1453_s19   ;;  %s1068_s18 = sphi %s1123_s18, %s1452_s18  }
   0xc   : > { %p45_p0 = scmp.ne.s32.totalorder %s1072_s19, %s1068_s18  ;;  %p1427_p1 = scmp.eq.s32.totalorder %s1144_s22, 0 }
   0xd   : > { %p164_p3 = scmp.eq.s32.totalorder %s693_s23, 1  ;;  %p694_p5 = scmp.ge.s32.totalorder %s1080_s21, 1 }
   0xe   : > { %p1153_p4 = por %p1427_p1, %p45_p0  ;;  %p171_p7 = scmp.lt.s32.totalorder %s1080_s21, 3 }
   0xf   : > { %p1158_p6 = por %p164_p3, %p45_p0  ;;  %s1082_s27 = smov [#allocation7]  }
  0x10   : > { %s1433_s24 = scalar_select %p1153_p4, 1, 0 }
  0x11   : > { %s1434_s25 = scalar_select %p1158_p6, 1, 0 }
  0x12   : > { %p1163_p8 = pnand %p694_p5, %p171_p7  ;;  %s183_s28 = sshll.u32 %s1082_s27, 4  ;;  %s1167_s28 = int_to_ptr.vmem [resolvable:$true] %s183_s28 }
  0x13   : > { %s1083_s30 = smov [#allocation8]   ;;  %s1084_s7 = smov [#allocation10]  }
  0x14   : > { %s1435_s26 = scalar_select %p1163_p8, 1, 0 }
  0x15   : > { %p787_p9 = pneg %p1163_p8  ;;  %s196_s6 = sshll.u32 %s1083_s30, 4  ;;  %s1178_s6 = int_to_ptr.vmem [resolvable:$true] %s196_s6 }
  0x16   : > { %s1180_s8 = sshll.u32 %s1084_s7, 4  ;;  %s1437_s2 = sld [smem:[#allocation17_spill]]  ;;  %s211_s8 = int_to_ptr.vmem [resolvable:$true] %s1180_s8 }
  0x17   : > { %p1174_p11 = pnand %p787_p9, %p1427_p1 }
  0x19   : > { %p1190_p13 = pneg %p1174_p11 }
  0x1c   : > { %s858_s11 = scalar_lea.hbm %s1437_s2, 512 }
  0x1d   : > { %p859_p12 = scmp.ne.s32.totalorder %s1437_s2, %s858_s11  ;;  %p865_p5 = scmp.lt.u32.totalorder %s858_s11, %s1437_s2 }
  0x1f   : > { %p861_p0 = pnand %p1190_p13, %p859_p12 }
  0x21   : > { %p862_p3 = pneg %p861_p0 }
  0x23   : > { %p867_p7 = pnand %p865_p5, %p862_p3 }
  0x25   : > { %870 = shalt.err (!%p867_p7)
}
  0x26   : > { %s871_s17 = scalar_lea.vmem %s1167_s28, 512  ;;  %p879_p2 = scmp.lt.s32.totalorder %s1167_s28, %s1167_s28 }
  0x27   : > { %p872_p9 = scmp.ne.s32.totalorder %s1167_s28, %s871_s17  ;;  %p880_p6 = scmp.lt.s32.totalorder %s871_s17, %s871_s17 }
  0x29   : > { %p874_p10 = pnand %p872_p9, %p1190_p13  ;;  %p881_p12 = por %p880_p6, %p879_p2 }
  0x2b   : > { %p875_p1 = pneg %p874_p10 }
  0x2d   : > { %p882_p0 = pnand %p881_p12, %p875_p1 }
  0x2f   : > { %885 = shalt.err (!%p882_p0)
}
  0x30   : > { %s1085_s23 = smov 128   ;;  %s1086_s27 = smov 8  }
  0x31   : > { %790 = dma.hbm_to_vmem [thread:$0]  (!%p1174_p11), %s1437_s2, 512, %s1167_s28, [#allocation6], %s1085_s23, %s1085_s23, %s1086_s27  }
  0x32   : > { %s1439_s3 = sld [smem:[#allocation18_spill]] }
  0x38   : > { %s886_s11 = scalar_lea.hbm %s1439_s3, 512 }
  0x39   : > { %p887_p2 = scmp.ne.s32.totalorder %s1439_s3, %s886_s11  ;;  %p893_p10 = scmp.lt.u32.totalorder %s886_s11, %s1439_s3 }
  0x3b   : > { %p889_p1 = pnand %p887_p2, %p1190_p13 }
  0x3d   : > { %p890_p6 = pneg %p889_p1 }
  0x3f   : > { %p895_p3 = pnand %p893_p10, %p890_p6 }
  0x41   : > { %898 = shalt.err (!%p895_p3)
}
  0x42   : > { %s899_s28 = scalar_lea.vmem %s1178_s6, 512  ;;  %p907_p12 = scmp.lt.s32.totalorder %s1178_s6, %s1178_s6 }
  0x43   : > { %p900_p5 = scmp.ne.s32.totalorder %s1178_s6, %s899_s28  ;;  %p908_p0 = scmp.lt.s32.totalorder %s899_s28, %s899_s28 }
  0x45   : > { %p902_p7 = pnand %p900_p5, %p1190_p13  ;;  %p909_p2 = por %p908_p0, %p907_p12 }
  0x47   : > { %p903_p9 = pneg %p902_p7 }
  0x49   : > { %p910_p1 = pnand %p909_p2, %p903_p9 }
  0x4b   : > { %913 = shalt.err (!%p910_p1)
}
  0x4c   : > { %793 = dma.hbm_to_vmem [thread:$0]  (!%p1174_p11), %s1439_s3, 512, %s1178_s6, [#allocation9], %s1085_s23, %s1085_s23, %s1086_s27  }
  0x4d   : > { %s914_s10 = scalar_lea.hbm %s1425_s4, 16 }
  0x4e   : > { %p915_p6 = scmp.ne.s32.totalorder %s1425_s4, %s914_s10  ;;  %p921_p5 = scmp.lt.u32.totalorder %s914_s10, %s1425_s4 }
  0x50   : > { %p917_p10 = pnand %p915_p6, %p1190_p13 }
  0x52   : > { %p918_p3 = pneg %p917_p10 }
  0x54   : > { %p923_p7 = pnand %p921_p5, %p918_p3 }
  0x56   : > { %926 = shalt.err (!%p923_p7)
}
  0x57   : > { %s927_s16 = scalar_lea.vmem %s211_s8, 16  ;;  %s934_s6 = scalar_lea.vmem %s211_s8, 32 }
  0x58   : > { %p928_p9 = scmp.ne.s32.totalorder %s211_s8, %s927_s16  ;;  %p935_p2 = scmp.lt.s32.totalorder %s211_s8, %s211_s8 }
  0x59   : > { %p936_p1 = scmp.lt.s32.totalorder %s934_s6, %s927_s16 }
  0x5a   : > { %p930_p12 = pnand %p928_p9, %p1190_p13 }
  0x5b   : > { %p937_p4 = por %p936_p1, %p935_p2 }
  0x5c   : > { %p931_p0 = pneg %p930_p12 }
  0x5e   : > { %p938_p8 = pnand %p937_p4, %p931_p0 }
  0x60   : > { %941 = shalt.err (!%p938_p8)
}
  0x61   : > { %796 = dma.hbm_to_vmem [thread:$0]  (!%p1174_p11), %s1425_s4, 16, %s211_s8, [#allocation9]  }
  0x62   : > { %s1254_s14 = sadd.s32 1, %s1080_s21   ;;  %s32_s29 = sadd.s32 1, %s1076_s20 }
  0x63   : > { %s29_s28 = ssub.s32 %s1080_s21, %s1254_s14  ;;  %p39_p8 = scmp.ne.s32.totalorder %s1076_s20, %s1072_s19 }
  0x64   : > { %p30_p4 = scmp.eq.s32.totalorder %s29_s28, 0  ;;  %p40_p13 = scmp.eq.s32.totalorder %s1080_s21, 0 }
  0x65   : > { %p811_p6 = scmp.lt.s32.totalorder %s1080_s21, 2  ;;  %p1440_p3 = scmp.eq.s32.totalorder %s1144_s22, 1 }
  0x66   : > { %s1264_s17 = scalar_select %p30_p4, %s1076_s20, %s32_s29  }
  0x67   : > { %p41_p10 = por %p40_p13, %p39_p8  ;;  %p1268_p5 = por %p1440_p3, %p39_p8 }
  0x68   : > { %s221_s7 = sand.u32 1, %s1076_s20   ;;  %s700_s9 = sshll.u32 %s1080_s21, 7 }
  0x69   : > { %s1441_s30 = scalar_select %p1268_p5, 1, 0 }
  0x6a   : > { %s1274_s8 = sshll.u32 %s221_s7, 3  ;;  %s1279_s12 = scalar_lea.hbm %s1421_s0, %s700_s9 }
  0x6b   : > { %s225_s13 = scalar_lea.vmem [#allocation2], %s1274_s8  ;;  %p1282_p11 = pnand %p811_p6, %p41_p10 }
  0x6c   : > { %s232_s15 = sshll.u32 %s225_s13, 4  ;;  %s1291_s27 = scalar_lea.hbm %s1422_s1, %s700_s9  ;;  %s1286_s15 = int_to_ptr.vmem [resolvable:$true] %s232_s15 }
  0x6d   : > { %s222_s28 = scalar_lea.sflag [#allocation3], %s221_s7  ;;  %s942_s29 = scalar_lea.hbm %s1279_s12, 128 }
  0x6e   : > { %p943_p7 = scmp.ne.s32.totalorder %s1279_s12, %s942_s29  ;;  %p944_p9 = pneg %p1282_p11 }
  0x6f   : > { %s947_s13 = scalar_lea.hbm %s1421_s0, 256  ;;  %p948_p2 = scmp.lt.u32.totalorder %s1279_s12, %s1421_s0 }
  0x70   : > { %p945_p12 = pnand %p944_p9, %p943_p7  ;;  %p949_p1 = scmp.lt.u32.totalorder %s947_s13, %s942_s29 }
  0x71   : > { %p951_p8 = scmp.lt.u32.totalorder %s942_s29, %s1279_s12 }
  0x72   : > { %p946_p0 = pneg %p945_p12  ;;  %p950_p4 = por %p949_p1, %p948_p2 }
  0x74   : > { %p952_p13 = por %p951_p8, %p950_p4 }
  0x76   : > { %p953_p6 = pnand %p952_p13, %p946_p0 }
  0x78   : > { %956 = shalt.err (!%p953_p6)
}
  0x79   : > { %s957_s7 = scalar_lea.vmem %s1286_s15, 128  ;;  %s1087_s9 = smov [#allocation2]  }
  0x7a   : > { %p958_p10 = scmp.ne.s32.totalorder %s1286_s15, %s957_s7  ;;  %s962_s6 = sshll.u32 %s1087_s9, 4  ;;  %s963_s6 = int_to_ptr.vmem [resolvable:$false] %s962_s6 }
  0x7b   : > { %s964_s2 = scalar_lea.vmem %s963_s6, 256  ;;  %p965_p12 = scmp.lt.s32.totalorder %s1286_s15, %s963_s6 }
  0x7c   : > { %p960_p3 = pnand %p958_p10, %p944_p9  ;;  %p966_p2 = scmp.lt.s32.totalorder %s964_s2, %s957_s7 }
  0x7e   : > { %p961_p7 = pneg %p960_p3  ;;  %p967_p1 = por %p966_p2, %p965_p12 }
  0x80   : > { %p968_p4 = pnand %p967_p1, %p961_p7 }
  0x82   : > { %971 = shalt.err (!%p968_p4)
}
  0x83   : > { %800 = dma.hbm_to_vmem [thread:$0]  (!%p1282_p11), %s1279_s12, 128, %s1286_s15, %s222_s28  }
  0x84   : > { %s239_s3 = sand.u32 1, %s1080_s21   ;;  %s243_s23 = scalar_lea.vmem [#allocation5], %s1274_s8 }
  0x85   : > { %s250_s29 = sshll.u32 %s243_s23, 4  ;;  %s240_s10 = scalar_lea.sflag [#allocation6], %s239_s3  ;;  %s251_s29 = int_to_ptr.vmem [resolvable:$true] %s250_s29 }
  0x86   : > { %s972_s11 = scalar_lea.hbm %s1291_s27, 128  ;;  %s977_s9 = scalar_lea.hbm %s1422_s1, 256 }
  0x87   : > { %p973_p0 = scmp.ne.s32.totalorder %s1291_s27, %s972_s11  ;;  %p978_p6 = scmp.lt.u32.totalorder %s1291_s27, %s1422_s1 }
  0x88   : > { %p979_p10 = scmp.lt.u32.totalorder %s977_s9, %s972_s11  ;;  %p981_p7 = scmp.lt.u32.totalorder %s972_s11, %s1291_s27 }
  0x89   : > { %p975_p8 = pnand %p973_p0, %p944_p9 }
  0x8a   : > { %p980_p3 = por %p979_p10, %p978_p6 }
  0x8b   : > { %p976_p13 = pneg %p975_p8 }
  0x8c   : > { %p982_p12 = por %p981_p7, %p980_p3 }
  0x8e   : > { %p983_p2 = pnand %p982_p12, %p976_p13 }
  0x90   : > { %986 = shalt.err (!%p983_p2)
}
  0x91   : > { %s987_s8 = scalar_lea.vmem %s251_s29, 128  ;;  %s1088_s12 = smov [#allocation5]  }
  0x92   : > { %p988_p1 = scmp.ne.s32.totalorder %s251_s29, %s987_s8  ;;  %s992_s15 = sshll.u32 %s1088_s12, 4  ;;  %s993_s15 = int_to_ptr.vmem [resolvable:$false] %s992_s15 }
  0x93   : > { %s994_s28 = scalar_lea.vmem %s993_s15, 256  ;;  %p995_p8 = scmp.lt.s32.totalorder %s251_s29, %s993_s15 }
  0x94   : > { %p990_p4 = pnand %p988_p1, %p944_p9  ;;  %p996_p5 = scmp.lt.s32.totalorder %s994_s28, %s987_s8 }
  0x96   : > { %p991_p0 = pneg %p990_p4  ;;  %p997_p6 = por %p996_p5, %p995_p8 }
  0x98   : > { %p998_p10 = pnand %p997_p6, %p991_p0 }
  0x9a   : > { %1001 = shalt.err (!%p998_p10)
}
  0x9b   : > { %803 = dma.hbm_to_vmem [thread:$0]  (!%p1282_p11), %s1291_s27, 128, %s251_s29, %s240_s10  }
  0x9c   : > { %p1443_p13 = scmp.ne.s32.totalorder %s1435_s26, 0 }
  0x9d   : > { %s1342_s3 = sand.u32 (!%p1443_p13), 1, %s1072_s19   ;;  %p1444_p5 = scmp.ne.s32.totalorder (!%p1443_p13), %s1433_s24, 0 }
  0x9e   : > { %259 = sbr.rel (%p1443_p13) target bundleno = 850 (0x352), region = 40  ;;  %s1345_s23 = sshll.u32 (!%p1443_p13), %s1342_s3, 3 }
  0x9f   : > { %s262_s11 = scalar_lea.sflag (!%p1443_p13), [#allocation3], %s1342_s3  ;;  %s265_s13 = scalar_lea.vmem (!%p1443_p13), [#allocation2], %s1345_s23 }
  0xa5   : > { %1047 = dma.done.wait (%p1444_p5), %s262_s11, 128  }
  0xa6   : > { %1049 = vsyncadd (%p1444_p5), %s262_s11, 4294967168  ;;  %s270_s26 = sand.u32 1, %s1144_s22   ;;  %s274_s27 = scalar_lea.vmem [#allocation5], %s1345_s23 }
  0xa7   : > { %s271_s16 = scalar_lea.sflag [#allocation6], %s270_s26 }
  0xa8   : > { %1051 = dma.done.wait (%p1444_p5), %s271_s16, 128  }
  0xa9   : > { %1053 = vsyncadd (%p1444_p5), %s271_s16, 4294967168  ;;  %p1445_p11 = scmp.eq.s32.totalorder %s1144_s22, 0 }
  0xab   : > { %1055 = dma.done.wait (%p1445_p11), [#allocation6], 512   ;;  %p1446_p9 = pmov %p1445_p11 }
  0xad   : > { %1057 = vsyncadd (%p1446_p9), [#allocation6], 4294966784  ;;  %p1447_p3 = pmov %p1446_p9 }
  0xaf   : > { %1059 = dma.done.wait (%p1447_p3), [#allocation9], 528   ;;  %p1448_p7 = pmov %p1447_p3 }
  0xb0   : > { %v1089_v0 = vmov 0.0|0.0   ;;  %vm1090_vm0 = vmmov 0   ;;  %v1091_v1 = vmov 0.0   ;;  %v319_v2 = vld [vmem:[#allocation7] sm:$0xff]  ;;  %v320_v3 = vld [vmem:[#allocation7 + $0x8] sm:$0xff]  ;;  %v321_v4 = vld [vmem:[#allocation7 + $0x10] sm:$0xff] }
  0xb1   : > { %1061 = vsyncadd (%p1448_p7), [#allocation9], 4294966768  ;;  %757 = vmatprep.subr.bf16.mxu0 %v1089_v0  ;;  %738 = vmatprep.mubr.msk.f32.mxu0 %vm1090_vm0, %v1091_v1  ;;  %v758_v5 = vpack.c.bf16 %v320_v3, %v319_v2  ;;  %v322_v6 = vld [vmem:[#allocation7 + $0x18] sm:$0xff]  ;;  %v318_v8 = vld [vmem:[%s265_s13] sm:$0xff]  ;;  %vm323_vm1 = vcmask 261120   ;;  %vm398_vm2 = vcmask 64512  }
  0xb2   : > { %741 = vmatprep.subr.mxu1 %v1091_v1  ;;  %743 = vmatprep.mubr.msk.f32.mxu1 %vm1090_vm0, %v1091_v1  ;;  %v761_v7 = vpack.c.bf16 %v322_v6, %v321_v4  ;;  %v472_v9 = vld [vmem:[#allocation8] sm:$0xff]  ;;  %v473_v10 = vld [vmem:[#allocation8 + $0x8] sm:$0xff]  ;;  %v397_v11 = vld [vmem:[%s274_s27] sm:$0xff]  ;;  %s715_s24 = sshll.u32 %s1144_s22, 7  ;;  %s317_s29 = scalar_lea.vmem [#allocation11], %s1345_s23 }
  0xb3   : > { %759 = vmatpush3.bf16.msra.mxu0 %v758_v5  ;;  %v764_v12 = vpack.c.bf16 %v473_v10, %v472_v9  ;;  %v474_v14 = vld [vmem:[#allocation8 + $0x10] sm:$0xff]  ;;  %v475_v15 = vld [vmem:[#allocation8 + $0x18] sm:$0xff]  ;;  %v712_v20 = vld [vmem:[#allocation10] ss:$0 sm:$0xff]  ;;  %s572_s10 = sshll.u32 %s317_s29, 4  ;;  %s1377_s6 = scalar_lea.hbm %s1426_s5, %s715_s24  ;;  %s1379_s10 = int_to_ptr.vmem [resolvable:$true] %s572_s10 }
  0xb4   : > { %760 = vmatprep.subr.bf16.mxu0 %v1089_v0  ;;  %v767_v17 = vpack.c.bf16 %v475_v15, %v474_v14  ;;  %s559_s2 = scalar_lea.sflag [#allocation4], %s1342_s3  ;;  %s1002_s8 = scalar_lea.vmem %s1379_s10, 128 }
  0xb5   : > { %p1003_p12 = scmp.ne.s32.totalorder %s1379_s10, %s1002_s8  ;;  %p1449_p2 = scmp.ne.s32.totalorder %s1441_s30, 0 }
  0xb6   : > { %s1092_s22 = smov [#allocation11]  }
  0xb7   : > { %762 = vmatpush3.bf16.msra.mxu0 %v761_v7  ;;  %p1004_p1 = pnand %p1003_p12, %p1449_p2  ;;  %s1006_s12 = sshll.u32 %s1092_s22, 4  ;;  %s1007_s12 = int_to_ptr.vmem [resolvable:$false] %s1006_s12 }
  0xb8   : > { %s1008_s15 = scalar_lea.vmem %s1007_s12, 256  ;;  %p1009_p0 = scmp.lt.s32.totalorder %s1379_s10, %s1007_s12 }
  0xb9   : > { %p1005_p4 = pneg %p1004_p1  ;;  %p1010_p8 = scmp.lt.s32.totalorder %s1008_s15, %s1002_s8 }
  0xba   : > { %739 = vmatmul.mubr.msk.f32.vlgmr.msra.gmra.mrb[0].mxu0 %vm323_vm1, %v318_v8 }
  0xbb   : > { %p1011_p6 = por %p1010_p8, %p1009_p0 }
  0xbd   : > { %p1012_p10 = pnand %p1011_p6, %p1005_p4 }
 0x18d   : > { %v393_v13 = vpop.f32.mrb[0].mxu0 }
 0x18e   : > { %v740_v16 = vpop.f32.mrb[1].mxu0  ;;  %742 = vmatpush3.msra.mxu1 %v393_v13 }
 0x18f   : > { %744 = vmatmul.mubr.msk.f32.vlgmr.msra.gmra.mrb[0].mxu1 %vm398_vm2, %v397_v11  ;;  %763 = vmatprep.subr.bf16.mxu1 %v1089_v0 }
 0x190   : > { %765 = vmatpush3.bf16.msra.mxu1 %v764_v12  ;;  %754 = vmatprep.mubr.msk.f32.mxu1 %vm1090_vm0, %v1091_v1 }
 0x191   : > { %766 = vmatprep.subr.bf16.mxu1 %v1089_v0 }
 0x194   : > { %768 = vmatpush3.bf16.msra.mxu1 %v767_v17 }
 0x262   : > { %v468_v18 = vpop.f32.mrb[0].mxu1 }
 0x263   : > { %v745_v19 = vpop.f32.mrb[1].mxu1  ;;  %755 = vmatmul.mubr.msk.f32.vlgmr.msra.gmra.mrb[2].mxu1 %vm323_vm1, %v468_v18 }
 0x336   : > { %v552_v21 = vpop.f32.mrb[2].mxu1 }
 0x337   : > { %v553_v22 = vadd.f32 %v712_v20, %v552_v21  ;;  %v756_v23 = vpop.f32.mrb[3].mxu1 }
 0x339   : > { %856 = vtanh.f32 %v553_v22 }
 0x343   : > { %v857_v24 = vpop.eup %856 }
 0x344   : > { %557 = vst [vmem:[%s317_s29] sm:$0xff] %v857_v24 }
 0x345   : > { %1015 = shalt.err (!%p1012_p10)
}
 0x346   : > { %s1016_s28 = scalar_lea.hbm %s1377_s6, 128  ;;  %s1020_s11 = scalar_lea.hbm %s1426_s5, 256 }
 0x347   : > { %p1017_p13 = scmp.ne.s32.totalorder %s1377_s6, %s1016_s28  ;;  %p1021_p9 = scmp.lt.u32.totalorder %s1377_s6, %s1426_s5 }
 0x348   : > { %p1022_p3 = scmp.lt.u32.totalorder %s1020_s11, %s1016_s28  ;;  %p1024_p12 = scmp.lt.u32.totalorder %s1016_s28, %s1377_s6 }
 0x349   : > { %p1018_p5 = pnand %p1017_p13, %p1449_p2 }
 0x34a   : > { %p1023_p7 = por %p1022_p3, %p1021_p9 }
 0x34b   : > { %p1019_p11 = pneg %p1018_p5 }
 0x34c   : > { %p1025_p1 = por %p1024_p12, %p1023_p7 }
 0x34e   : > { %p1026_p4 = pnand %p1025_p1, %p1019_p11 }
 0x350   : > { %1029 = shalt.err (!%p1026_p4)
}
 0x351   : > { %785 = dma.vmem_to_hbm [thread:$0]  (%p1449_p2), %s1379_s10, 128, %s1377_s6, %s559_s2  }
 0x352 PF: > { %s584_s16 = sand.u32 1, %s1068_s18   ;;  %p1450_p0 = scmp.ne.s32.totalorder %s1434_s25, 0 }
 0x353   : > { %p1451_p8 = scmp.ge.s32.totalorder %s1080_s21, 2  ;;  %s585_s27 = scalar_lea.sflag [#allocation4], %s584_s16 }
 0x355   : > { %p805_p6 = pnand %p1451_p8, %p1450_p0 }
 0x357   : > { %1063 = dma.done.wait (!%p805_p6), %s585_s27, 128  }
 0x358   : > { %1065 = vsyncadd (!%p805_p6), %s585_s27, 4294967168  ;;  %p22_p10 = scmp.ge.s32.totalorder %s1254_s14, 4   ;;  %s1452_s18 = smov %s1072_s19 }
 0x359   : > { %s1453_s19 = smov %s1076_s20  ;;  %s1454_s20 = smov %s1264_s17 }
 0x35a   : > { %s1455_s21 = smov %s1254_s14  ;;  %24 = sbr.rel (!%p22_p10) target bundleno = 11 (0xb), region = 110 }
 0x361   :  { %590 = vsyncpa [#allocation3], 1 }
 0x362   :  { %592 = vsyncpa [#allocation3 + $0x1], 1 }
 0x363   :  { %593 = vsyncpa [#allocation6], 1 }
 0x364   :  { %595 = vsyncpa [#allocation6 + $0x1], 1 }
 0x365   :  { %596 = vsyncpa [#allocation9], 1 }
 0x366   :  { %597 = vsyncpa [#allocation4], 1 }
 0x367   :  { %599 = vsyncpa [#allocation4 + $0x1], 1 }

</bundles_post_ra>
